<compile_context>
chip_gen: v6e
topology: v6e:2x2x1
jax: 0.10.0
libtpu: 0.0.40
codegen_flags: <defaults>
</compile_context>

<pallas_src>
import numpy as np
import jax
import jax.numpy as jnp
from jax.experimental import pallas as pl
from jax.experimental.pallas import tpu as pltpu

ORDER = ['back', 'down', 'front', 'left', 'right', 'up']
# axis of xyz used for normalization, per face (back/front->z=2, down/up->y=1, left/right->x=0)
FACE_AXES = (2, 1, 2, 0, 0, 1)

_LANE = 128


# ----------------------------------------------------------------------------------
# Kernel
# ----------------------------------------------------------------------------------
def depth2points_kernel(x_ref, g_ref, o_ref):
    # x_ref : VMEM (B_blk, 6, S_blk)    depth (all 6 faces of B_blk batch items)
    # g_ref : VMEM (18, S_blk)          pre-normalized ray grid; row r = 3*face + chan
    # o_ref : VMEM (B_blk, 18, S_blk)   point cloud; row r = 3*face + chan
    #
    # Pure HBM-bound streaming: 3 broadcast multiplies per face, no divide/abs.
    for j in range(6):                               # static unroll over the 6 faces
        dj = x_ref[:, j, :]                          # (B_blk, S_blk)
        gj = g_ref[3 * j:3 * j + 3, :]               # (3, S_blk)
        o_ref[:, 3 * j:3 * j + 3, :] = dj[:, None, :] * gj[None, :, :]


# ----------------------------------------------------------------------------------
# Tiling / budgeting helpers
# ----------------------------------------------------------------------------------
def _round_up(x, m):
    return ((x + m - 1) // m) * m


def _vmem_capacity_bytes():
    """Physical VMEM of the current TPU generation (conservative fallback: 64 MiB)."""
    try:
        return int(pltpu.get_tpu_info().vmem_capacity_bytes)
    except Exception:
        return 64 * 2**20


def _pick_spatial_block(S, max_blk=8192):
    """Lane-dense spatial block.

    Prefer the full extent (always legal) or an exact multiple-of-128 divisor of S;
    otherwise return a fixed 128-multiple block and let a pl.cdiv grid + Pallas
    masking handle the ragged tail (never a full-S block that could blow VMEM).
    """
    if S <= max_blk:
        return S
    top = (max_blk // _LANE) * _LANE
    c = top
    while c >= _LANE:
        if S % c == 0:
            return c
        c -= _LANE
    return top


def _pick_batch_block(bs, s_blk, target_elems):
    """B_blk so that B_blk * s_blk ~ target_elems; prefer an exact divisor of bs."""
    b = max(1, min(bs, target_elems // max(1, s_blk)))
    d = b
    while bs % d != 0:
        d -= 1
    return d if 2 * d >= b else b     # only accept the ragged tail if the divisor is <half


# ----------------------------------------------------------------------------------
# Wrapper
# ----------------------------------------------------------------------------------
def precompute_gnorm(xyz_grid, dtype=jnp.float32):
    """One-time grid normalization, hoisted out of the per-call path.

    gnorm[3*j + c, s] = grid[j, :, :, c] / |grid[j, :, :, FACE_AXES[j]]|  flattened.
    Like the PyTorch reference, assumes the selected-axis component is never zero
    (true for cube-face ray grids, |component| == 0.5).
    """
    six, h, w, three = xyz_grid.shape
    assert six == 6 and three == 3
    denom = jnp.abs(jnp.stack(
        [xyz_grid[j, :, :, FACE_AXES[j]] for j in range(6)], axis=0))       # (6, h, w)
    g = jnp.transpose(xyz_grid, (0, 3, 1, 2)) / denom[:, None, :, :]        # (6, 3, h, w)
    return g.reshape(18, h * w).astype(dtype)                               # (18, h*w)


def depth2points(x, xyz_grid=None, *, gnorm=None, channels_last=True):
    """x: (bs*6, 1, h, w), xyz_grid: (6, h, w, 3) ->
       (bs*6, h, w, 3)  if channels_last (PyTorch Depth2Points layout), else
       (bs*6, 3, h, w)  (kernel-native, transpose-free fast path).

    Pass gnorm=precompute_gnorm(xyz_grid) to hoist the grid normalization when the
    grid is static across calls."""
    N, c, h, w = x.shape
    assert c == 1 and N % 6 == 0, "Batch size mismatch in Depth2Points"
    bs = N // 6
    S = h * w
    dtype = x.dtype

    if gnorm is None:
        assert xyz_grid is not None, "need xyz_grid or a precomputed gnorm"
        gnorm = precompute_gnorm(xyz_grid, dtype)
    gnorm = gnorm.astype(dtype)
    assert gnorm.shape == (18, S)

    # Free reshape: (bs*6, 1, h, w) -> (bs, 6, h*w); spatial axis is lane-dense.
    x_r = x.reshape(bs, 6, S)

    # ---- generation-conditioned tiling & VMEM budget -----------------------------
    capacity = _vmem_capacity_bytes()
    if capacity <= 64 * 2**20:
        # v7x-class: least VMEM (64 MiB) but highest per-TC HBM BW -> most
        # per-step-overhead-sensitive.  Keep the padded double-buffered footprint
        # comfortably under the 32 MiB default scoped budget / 48 MiB cap.
        target_elems = 64 * 1024          # ~4.5 MiB useful f32 output per step
        vmem_cap = 48 * 2**20
    else:
        # v5e / v6e: 128 MiB physical VMEM -> go bigger and raise the scoped limit.
        target_elems = 128 * 1024         # ~9 MiB useful f32 output per step
        vmem_cap = 96 * 2**20

    S_blk = _pick_spatial_block(S, max_blk=8192)
    B_blk = _pick_batch_block(bs, S_blk, target_elems)
    # Spatial axis OUTER so the gnorm block index is constant across the inner batch
    # loop (gnorm DMA'd only S_tiles times, stays resident in VMEM).
    grid = (pl.cdiv(S, S_blk), pl.cdiv(bs, B_blk))

    # Padded VMEM footprint: second-to-last dims rounded to the dtype sublane tile,
    # last dim to 128 lanes, two pipeline buffers per array, + headroom.
    itemsize = jnp.dtype(dtype).itemsize
    sub = (8 * 4) // itemsize                      # f32 -> 8 sublanes, bf16 -> 16
    S_pad = _round_up(S_blk, _LANE)
    x_tile = B_blk * _round_up(6, sub) * S_pad * itemsize
    g_tile = _round_up(18, sub) * S_pad * itemsize
    o_tile = B_blk * _round_up(18, sub) * S_pad * itemsize
    vmem_need = 2 * (x_tile + g_tile + o_tile)     # double-buffered pipeline
    vmem_limit = int(min(vmem_cap,
                         max(int(vmem_need * 1.25) + (2 << 20), 16 * 2**20)))

    out = pl.pallas_call(
        depth2points_kernel,
        out_shape=jax.ShapeDtypeStruct((bs, 18, S), dtype),
        grid=grid,
        in_specs=[
            pl.BlockSpec((B_blk, 6, S_blk), lambda s, b: (b, 0, s)),
            pl.BlockSpec((18, S_blk), lambda s, b: (0, s)),
        ],
        out_specs=pl.BlockSpec((B_blk, 18, S_blk), lambda s, b: (b, 0, s)),
        compiler_params=pltpu.CompilerParams(
            # Only the (outer) spatial axis is sharded across cores so the gnorm
            # residency assumption holds per core; batch axis is a plain inner loop.
            dimension_semantics=("parallel", "arbitrary"),
            vmem_limit_bytes=vmem_limit),
    )(x_r, gnorm)

    out = out.reshape(N, 3, h, w)                  # free reshape (channels-first)
    if channels_last:
        # Exact PyTorch Depth2Points layout (N, h, w, 3).  This XLA permute
        # re-reads/re-writes the whole 3-channel output (~60% of end-to-end HBM
        # traffic) — internal consumers should pass channels_last=False instead.
        # TODO(synk): fuse this permute into the consumer for mem-bound pipelines.
        out = jnp.transpose(out, (0, 2, 3, 1))
    return out


# ----------------------------------------------------------------------------------
# Synthetic grid + pure-JAX reference (matches the PyTorch forward exactly)
# ----------------------------------------------------------------------------------
def make_cube_xyz_grid(face_w):
    """Deterministic synthetic xyz grid, shape (6, face_w, face_w, 3),
    mimicking Equirec2Cube's cube-face ray grid (half side = 0.5)."""
    rng = np.linspace(-0.5 + 0.5 / face_w, 0.5 - 0.5 / face_w, face_w, dtype=np.float32)
    u, v = np.meshgrid(rng, rng)
    half = np.full_like(u, 0.5)
    faces = {
        'back':  np.stack([-u,  v, -half], axis=-1),
        'down':  np.stack([ u, -half, v], axis=-1),
        'front': np.stack([ u,  v,  half], axis=-1),
        'left':  np.stack([-half, v,  u], axis=-1),
        'right': np.stack([ half, v, -u], axis=-1),
        'up':    np.stack([ u,  half, -v], axis=-1),
    }
    grid = np.stack([faces[f] for f in ORDER], axis=0)   # (6, h, w, 3)
    return jnp.asarray(grid)


def depth2points_ref(x, xyz_grid):
    """Pure-JAX reference (divide-then-multiply, exactly like the PyTorch module)."""
    N, _, h, w = x.shape
    pts = []
    for i in range(N):
        j = i % 6
        depth = x[i, 0]                                   # (h, w)
        denom = jnp.abs(xyz_grid[j, :, :, FACE_AXES[j]])  # (h, w)
        scale = depth / denom
        pts.append(scale[..., None] * xyz_grid[j])        # (h, w, 3)
    return jnp.stack(pts, axis=0)                         # (N, h, w, 3)


if __name__ == "__main__":
    bs, h, w = 2, 16, 16
    N = bs * 6

    key = jax.random.PRNGKey(0)
    # positive depths, like a cubemap depth render
    x = jax.random.uniform(key, (N, 1, h, w), dtype=jnp.float32, minval=0.5, maxval=5.0)
    xyz_grid = make_cube_xyz_grid(h)

    # Hoist the one-time grid normalization out of the per-call path (static grid).
    gnorm = precompute_gnorm(xyz_grid, jnp.float32)

    out = jax.block_until_ready(depth2points(x, xyz_grid, gnorm=gnorm))

    ref = depth2points_ref(x, xyz_grid)
    assert out.shape == (N, h, w, 3)
    # Note: kernel computes depth*(g/|g_axis|) vs reference (depth/|g_axis|)*g —
    # reassociated, ~1 ulp difference, well within tolerance.
    np.testing.assert_allclose(np.asarray(out), np.asarray(ref), rtol=1e-5, atol=1e-5)

    print("KERNEL_OK")
</pallas_src>

<mosaic_0001>
module attributes {stable_mosaic.version = 11 : i64} {
  func.func @depth2points_kernel(%arg0: i32, %arg1: i32, %arg2: memref<2x6x256xf32, #tpu.memory_space<vmem>>, %arg3: memref<18x256xf32, #tpu.memory_space<vmem>>, %arg4: memref<2x18x256xf32, #tpu.memory_space<vmem>>) attributes {dimension_semantics = [#tpu.dimension_semantics<parallel>, #tpu.dimension_semantics<arbitrary>], iteration_bounds = array<i64: 1, 1>, scalar_prefetch = 0 : i64, scratch_operands = 0 : i64, tpu.core_type = #tpu.core_type<tc>, window_params = [{transform_indices = @transform_0, window_bounds = array<i64: 2, 6, 256>}, {transform_indices = @transform_1, window_bounds = array<i64: 18, 256>}, {transform_indices = @transform_2, window_bounds = array<i64: 2, 18, 256>}]} {
    %c0 = arith.constant 0 : index
    %c0_0 = arith.constant 0 : index
    %c0_1 = arith.constant 0 : index
    %0 = vector.load %arg2[%c0, %c0_0, %c0_1] : memref<2x6x256xf32, #tpu.memory_space<vmem>>, vector<2x1x256xf32>
    %1 = vector.shape_cast %0 : vector<2x1x256xf32> to vector<2x256xf32>
    %c0_2 = arith.constant 0 : index
    %c0_3 = arith.constant 0 : index
    %2 = vector.load %arg3[%c0_2, %c0_3] : memref<18x256xf32, #tpu.memory_space<vmem>>, vector<3x256xf32>
    %3 = vector.shape_cast %1 : vector<2x256xf32> to vector<2x1x256xf32>
    %4 = vector.shape_cast %2 : vector<3x256xf32> to vector<1x3x256xf32>
    %5 = vector.broadcast %3 : vector<2x1x256xf32> to vector<2x3x256xf32>
    %6 = vector.broadcast %4 : vector<1x3x256xf32> to vector<2x3x256xf32>
    %7 = arith.mulf %5, %6 : vector<2x3x256xf32>
    %c0_4 = arith.constant 0 : index
    %c0_5 = arith.constant 0 : index
    %c0_6 = arith.constant 0 : index
    %8 = vector.load %arg4[%c0_4, %c0_5, %c0_6] : memref<2x18x256xf32, #tpu.memory_space<vmem>>, vector<2x3x256xf32>
    tpu.vector_store %arg4[%c0_4, %c0_5, %c0_6], %7 {strides = array<i32>} : memref<2x18x256xf32, #tpu.memory_space<vmem>>, vector<2x3x256xf32>,
    %c0_7 = arith.constant 0 : index
    %c1 = arith.constant 1 : index
    %c0_8 = arith.constant 0 : index
    %9 = vector.load %arg2[%c0_7, %c1, %c0_8] : memref<2x6x256xf32, #tpu.memory_space<vmem>>, vector<2x1x256xf32>
    %10 = vector.shape_cast %9 : vector<2x1x256xf32> to vector<2x256xf32>
    %c3 = arith.constant 3 : index
    %c0_9 = arith.constant 0 : index
    %11 = vector.load %arg3[%c3, %c0_9] : memref<18x256xf32, #tpu.memory_space<vmem>>, vector<3x256xf32>
    %12 = vector.shape_cast %10 : vector<2x256xf32> to vector<2x1x256xf32>
    %13 = vector.shape_cast %11 : vector<3x256xf32> to vector<1x3x256xf32>
    %14 = vector.broadcast %12 : vector<2x1x256xf32> to vector<2x3x256xf32>
    %15 = vector.broadcast %13 : vector<1x3x256xf32> to vector<2x3x256xf32>
    %16 = arith.mulf %14, %15 : vector<2x3x256xf32>
    %c0_10 = arith.constant 0 : index
    %c3_11 = arith.constant 3 : index
    %c0_12 = arith.constant 0 : index
    %17 = vector.load %arg4[%c0_10, %c3_11, %c0_12] : memref<2x18x256xf32, #tpu.memory_space<vmem>>, vector<2x3x256xf32>
    tpu.vector_store %arg4[%c0_10, %c3_11, %c0_12], %16 {strides = array<i32>} : memref<2x18x256xf32, #tpu.memory_space<vmem>>, vector<2x3x256xf32>,
    %c0_13 = arith.constant 0 : index
    %c2 = arith.constant 2 : index
    %c0_14 = arith.constant 0 : index
    %18 = vector.load %arg2[%c0_13, %c2, %c0_14] : memref<2x6x256xf32, #tpu.memory_space<vmem>>, vector<2x1x256xf32>
    %19 = vector.shape_cast %18 : vector<2x1x256xf32> to vector<2x256xf32>
    %c6 = arith.constant 6 : index
    %c0_15 = arith.constant 0 : index
    %20 = vector.load %arg3[%c6, %c0_15] : memref<18x256xf32, #tpu.memory_space<vmem>>, vector<3x256xf32>
    %21 = vector.shape_cast %19 : vector<2x256xf32> to vector<2x1x256xf32>
    %22 = vector.shape_cast %20 : vector<3x256xf32> to vector<1x3x256xf32>
    %23 = vector.broadcast %21 : vector<2x1x256xf32> to vector<2x3x256xf32>
    %24 = vector.broadcast %22 : vector<1x3x256xf32> to vector<2x3x256xf32>
    %25 = arith.mulf %23, %24 : vector<2x3x256xf32>
    %c0_16 = arith.constant 0 : index
    %c6_17 = arith.constant 6 : index
    %c0_18 = arith.constant 0 : index
    %26 = vector.load %arg4[%c0_16, %c6_17, %c0_18] : memref<2x18x256xf32, #tpu.memory_space<vmem>>, vector<2x3x256xf32>
    tpu.vector_store %arg4[%c0_16, %c6_17, %c0_18], %25 {strides = array<i32>} : memref<2x18x256xf32, #tpu.memory_space<vmem>>, vector<2x3x256xf32>,
    %c0_19 = arith.constant 0 : index
    %c3_20 = arith.constant 3 : index
    %c0_21 = arith.constant 0 : index
    %27 = vector.load %arg2[%c0_19, %c3_20, %c0_21] : memref<2x6x256xf32, #tpu.memory_space<vmem>>, vector<2x1x256xf32>
    %28 = vector.shape_cast %27 : vector<2x1x256xf32> to vector<2x256xf32>
    %c9 = arith.constant 9 : index
    %c0_22 = arith.constant 0 : index
    %29 = vector.load %arg3[%c9, %c0_22] : memref<18x256xf32, #tpu.memory_space<vmem>>, vector<3x256xf32>
    %30 = vector.shape_cast %28 : vector<2x256xf32> to vector<2x1x256xf32>
    %31 = vector.shape_cast %29 : vector<3x256xf32> to vector<1x3x256xf32>
    %32 = vector.broadcast %30 : vector<2x1x256xf32> to vector<2x3x256xf32>
    %33 = vector.broadcast %31 : vector<1x3x256xf32> to vector<2x3x256xf32>
    %34 = arith.mulf %32, %33 : vector<2x3x256xf32>
    %c0_23 = arith.constant 0 : index
    %c9_24 = arith.constant 9 : index
    %c0_25 = arith.constant 0 : index
    %35 = vector.load %arg4[%c0_23, %c9_24, %c0_25] : memref<2x18x256xf32, #tpu.memory_space<vmem>>, vector<2x3x256xf32>
    tpu.vector_store %arg4[%c0_23, %c9_24, %c0_25], %34 {strides = array<i32>} : memref<2x18x256xf32, #tpu.memory_space<vmem>>, vector<2x3x256xf32>,
    %c0_26 = arith.constant 0 : index
    %c4 = arith.constant 4 : index
    %c0_27 = arith.constant 0 : index
    %36 = vector.load %arg2[%c0_26, %c4, %c0_27] : memref<2x6x256xf32, #tpu.memory_space<vmem>>, vector<2x1x256xf32>
    %37 = vector.shape_cast %36 : vector<2x1x256xf32> to vector<2x256xf32>
    %c12 = arith.constant 12 : index
    %c0_28 = arith.constant 0 : index
    %38 = vector.load %arg3[%c12, %c0_28] : memref<18x256xf32, #tpu.memory_space<vmem>>, vector<3x256xf32>
    %39 = vector.shape_cast %37 : vector<2x256xf32> to vector<2x1x256xf32>
    %40 = vector.shape_cast %38 : vector<3x256xf32> to vector<1x3x256xf32>
    %41 = vector.broadcast %39 : vector<2x1x256xf32> to vector<2x3x256xf32>
    %42 = vector.broadcast %40 : vector<1x3x256xf32> to vector<2x3x256xf32>
    %43 = arith.mulf %41, %42 : vector<2x3x256xf32>
    %c0_29 = arith.constant 0 : index
    %c12_30 = arith.constant 12 : index
    %c0_31 = arith.constant 0 : index
    %44 = vector.load %arg4[%c0_29, %c12_30, %c0_31] : memref<2x18x256xf32, #tpu.memory_space<vmem>>, vector<2x3x256xf32>
    tpu.vector_store %arg4[%c0_29, %c12_30, %c0_31], %43 {strides = array<i32>} : memref<2x18x256xf32, #tpu.memory_space<vmem>>, vector<2x3x256xf32>,
    %c0_32 = arith.constant 0 : index
    %c5 = arith.constant 5 : index
    %c0_33 = arith.constant 0 : index
    %45 = vector.load %arg2[%c0_32, %c5, %c0_33] : memref<2x6x256xf32, #tpu.memory_space<vmem>>, vector<2x1x256xf32>
    %46 = vector.shape_cast %45 : vector<2x1x256xf32> to vector<2x256xf32>
    %c15 = arith.constant 15 : index
    %c0_34 = arith.constant 0 : index
    %47 = vector.load %arg3[%c15, %c0_34] : memref<18x256xf32, #tpu.memory_space<vmem>>, vector<3x256xf32>
    %48 = vector.shape_cast %46 : vector<2x256xf32> to vector<2x1x256xf32>
    %49 = vector.shape_cast %47 : vector<3x256xf32> to vector<1x3x256xf32>
    %50 = vector.broadcast %48 : vector<2x1x256xf32> to vector<2x3x256xf32>
    %51 = vector.broadcast %49 : vector<1x3x256xf32> to vector<2x3x256xf32>
    %52 = arith.mulf %50, %51 : vector<2x3x256xf32>
    %c0_35 = arith.constant 0 : index
    %c15_36 = arith.constant 15 : index
    %c0_37 = arith.constant 0 : index
    %53 = vector.load %arg4[%c0_35, %c15_36, %c0_37] : memref<2x18x256xf32, #tpu.memory_space<vmem>>, vector<2x3x256xf32>
    tpu.vector_store %arg4[%c0_35, %c15_36, %c0_37], %52 {strides = array<i32>} : memref<2x18x256xf32, #tpu.memory_space<vmem>>, vector<2x3x256xf32>,
    return
  }
  func.func @transform_0(%arg0: i32, %arg1: i32) -> (i32, i32, i32) {
    %c0_i32 = arith.constant 0 : i32
    %c0_i32_0 = arith.constant 0 : i32
    return %arg1, %c0_i32, %arg0 : i32, i32, i32
  }
  func.func @transform_1(%arg0: i32, %arg1: i32) -> (i32, i32) {
    %c0_i32 = arith.constant 0 : i32
    %c0_i32_0 = arith.constant 0 : i32
    return %c0_i32, %arg0 : i32, i32
  }
  func.func @transform_2(%arg0: i32, %arg1: i32) -> (i32, i32, i32) {
    %c0_i32 = arith.constant 0 : i32
    %c0_i32_0 = arith.constant 0 : i32
    return %arg1, %c0_i32, %arg0 : i32, i32, i32
  }
}

</mosaic_0001>

<bundles_post_ra>
// kernel: tpu_custom_call.1
= control target key start
LH: loop header
LB: loop body
LE: loop exit
PB: predicated region body
PF: predicated region fallthrough
CT: control target
= control target key end

     0   :  { %v18_v0 = vlaneseq  ;;  %s484_s0 = inlined_call_operand.vmem [shape: f32[2,6,256], index: 0, kind: input, shape index: {}]   ;;  %s485_s1 = inlined_call_operand.vmem [shape: f32[18,256], index: 1, kind: input, shape index: {}]   ;;  %s486_s2 = inlined_call_operand.vmem [shape: f32[2,18,256], index: 2, kind: output, shape index: {}]  }
   0x1   :  { %v11_v1 = vld [vmem:[%s484_s0] ss:$8 sm:$0x3]  ;;  %v250_v5 = vld [vmem:[%s484_s0 + $0x10] ss:$8 sm:$0x3] }
   0x2   :  { %v19_v2 = vshrl.u32 %v18_v0, 7  ;;  %v14_v3 = vld [vmem:[%s485_s1] sm:$0x7]  ;;  %v15_v4 = vld [vmem:[%s485_s1 + $0x8] sm:$0x7] }
   0x3   :  { %v251_v8 = vld [vmem:[%s484_s0 + $0x1] ss:$8 sm:$0x3]  ;;  %v50_v9 = vld [vmem:[%s485_s1] sm:$0x38] }
   0x4   :  { %v288_v6 = vsub.s32 0, %v19_v2  ;;  %v290_v7 = vsub.s32 1, %v19_v2  ;;  %v252_v10 = vld [vmem:[%s484_s0 + $0x11] ss:$8 sm:$0x3] }
   0x5   :  { %v51_v15 = vld [vmem:[%s485_s1 + $0x8] sm:$0x38]  ;;  %v253_v16 = vld [vmem:[%s484_s0 + $0x2] ss:$8 sm:$0x3] }
   0x6   :  { %v21_v11 = vrot.slane %v11_v1, %v288_v6  ;;  %v25_v12 = vrot.slane %v11_v1, %v290_v7  ;;  %v29_v13 = vrot.slane %v250_v5, %v288_v6  ;;  %v33_v14 = vrot.slane %v250_v5, %v290_v7  ;;  %v86_v21 = vld [vmem:[%s485_s1] sm:$0xc0]  ;;  %v87_v22 = vld [vmem:[%s485_s1 + $0x8] sm:$0xc0]  ;;  %v88_v28 = vld [vmem:[%s485_s1 + $0x10] sm:$0x1] }
   0x7   :  { %v57_v17 = vrot.slane %v251_v8, %v288_v6  ;;  %v61_v18 = vrot.slane %v251_v8, %v290_v7  ;;  %v65_v19 = vrot.slane %v252_v10, %v288_v6  ;;  %v69_v20 = vrot.slane %v252_v10, %v290_v7  ;;  %v254_v23 = vld [vmem:[%s484_s0 + $0x12] ss:$8 sm:$0x3]  ;;  %v255_v29 = vld [vmem:[%s484_s0 + $0x3] ss:$8 sm:$0x3] }
   0x8   :  { %v38_v24 = vmul.f32 %v21_v11, %v14_v3  ;;  %v39_v25 = vmul.f32 %v25_v12, %v15_v4  ;;  %v40_v26 = vmul.f32 %v29_v13, %v14_v3  ;;  %v41_v27 = vmul.f32 %v33_v14, %v15_v4  ;;  %v89_v34 = vld [vmem:[%s485_s1 + $0x18] sm:$0x1]  ;;  %v256_v35 = vld [vmem:[%s484_s0 + $0x13] ss:$8 sm:$0x3] }
   0x9   :  { %v74_v30 = vmul.f32 %v57_v17, %v50_v9  ;;  %v75_v31 = vmul.f32 %v61_v18, %v51_v15  ;;  %v76_v32 = vmul.f32 %v65_v19, %v50_v9  ;;  %v77_v33 = vmul.f32 %v69_v20, %v51_v15  ;;  %v132_v40 = vld [vmem:[%s485_s1 + $0x10] sm:$0xe]  ;;  %v133_v42 = vld [vmem:[%s485_s1 + $0x18] sm:$0xe]  ;;  %v168_v62 = vld [vmem:[%s485_s1 + $0x10] sm:$0x70] }
   0xa   :  { %42 = vst [vmem:[%s486_s2] sm:$0x7] %v38_v24  ;;  %43 = vst [vmem:[%s486_s2 + $0x8] sm:$0x7] %v39_v25  ;;  %v95_v36 = vrot.slane %v253_v16, %v288_v6  ;;  %v99_v37 = vrot.slane %v253_v16, %v290_v7  ;;  %v103_v38 = vrot.slane %v254_v23, %v288_v6  ;;  %v257_v50 = vld [vmem:[%s484_s0 + $0x4] ss:$8 sm:$0x3] }
   0xb   :  { %44 = vst [vmem:[%s486_s2 + $0x30] sm:$0x7] %v40_v26  ;;  %45 = vst [vmem:[%s486_s2 + $0x38] sm:$0x7] %v41_v27  ;;  %v107_v39 = vrot.slane %v254_v23, %v290_v7  ;;  %v139_v41 = vrot.slane %v255_v29, %v288_v6  ;;  %v143_v43 = vrot.slane %v255_v29, %v290_v7  ;;  %v169_v63 = vld [vmem:[%s485_s1 + $0x18] sm:$0x70] }
   0xc   :  { %78 = vst [vmem:[%s486_s2] sm:$0x38] %v74_v30  ;;  %79 = vst [vmem:[%s486_s2 + $0x8] sm:$0x38] %v75_v31  ;;  %v147_v44 = vrot.slane %v256_v35, %v288_v6  ;;  %v151_v45 = vrot.slane %v256_v35, %v290_v7  ;;  %v112_v46 = vmul.f32 %v95_v36, %v86_v21  ;;  %v258_v51 = vld [vmem:[%s484_s0 + $0x14] ss:$8 sm:$0x3] }
   0xd   :  { %80 = vst [vmem:[%s486_s2 + $0x30] sm:$0x38] %v76_v32  ;;  %81 = vst [vmem:[%s486_s2 + $0x38] sm:$0x38] %v77_v33  ;;  %v113_v47 = vmul.f32 %v99_v37, %v87_v22  ;;  %v114_v48 = vmul.f32 %v95_v36, %v88_v28  ;;  %v115_v49 = vmul.f32 %v99_v37, %v89_v34  ;;  %v204_v0 = vld [vmem:[%s485_s1 + $0x10] sm:$0x80] }
   0xe   :  { %v116_v52 = vmul.f32 %v103_v38, %v86_v21  ;;  %v117_v53 = vmul.f32 %v107_v39, %v87_v22  ;;  %v118_v54 = vmul.f32 %v103_v38, %v88_v28  ;;  %v119_v55 = vmul.f32 %v107_v39, %v89_v34  ;;  %v259_v56 = vld [vmem:[%s484_s0 + $0x5] ss:$8 sm:$0x3]  ;;  %v260_v57 = vld [vmem:[%s484_s0 + $0x15] ss:$8 sm:$0x3] }
   0xf   :  { %120 = vst [vmem:[%s486_s2] sm:$0xc0] %v112_v46  ;;  %121 = vst [vmem:[%s486_s2 + $0x8] sm:$0xc0] %v113_v47  ;;  %v156_v58 = vmul.f32 %v139_v41, %v132_v40  ;;  %v157_v59 = vmul.f32 %v143_v43, %v133_v42  ;;  %v158_v60 = vmul.f32 %v147_v44, %v132_v40  ;;  %v205_v5 = vld [vmem:[%s485_s1 + $0x18] sm:$0x80] }
  0x10   :  { %122 = vst [vmem:[%s486_s2 + $0x10] sm:$0x1] %v114_v48  ;;  %123 = vst [vmem:[%s486_s2 + $0x18] sm:$0x1] %v115_v49  ;;  %v159_v61 = vmul.f32 %v151_v45, %v133_v42  ;;  %v175_v1 = vrot.slane %v257_v50, %v288_v6  ;;  %v179_v2 = vrot.slane %v257_v50, %v290_v7  ;;  %v206_v8 = vld [vmem:[%s485_s1 + $0x20] sm:$0x3] }
  0x11   :  { %124 = vst [vmem:[%s486_s2 + $0x30] sm:$0xc0] %v116_v52  ;;  %125 = vst [vmem:[%s486_s2 + $0x38] sm:$0xc0] %v117_v53  ;;  %v183_v3 = vrot.slane %v258_v51, %v288_v6  ;;  %v187_v4 = vrot.slane %v258_v51, %v290_v7  ;;  %v207_v9 = vld [vmem:[%s485_s1 + $0x28] sm:$0x3]  ;;  %v213_v10 = vrot.slane %v259_v56, %v288_v6 }
  0x12   :  { %126 = vst [vmem:[%s486_s2 + $0x40] sm:$0x1] %v118_v54  ;;  %127 = vst [vmem:[%s486_s2 + $0x48] sm:$0x1] %v119_v55  ;;  %v217_v11 = vrot.slane %v259_v56, %v290_v7  ;;  %v221_v12 = vrot.slane %v260_v57, %v288_v6  ;;  %v225_v13 = vrot.slane %v260_v57, %v290_v7 }
  0x13   :  { %160 = vst [vmem:[%s486_s2 + $0x10] sm:$0xe] %v156_v58  ;;  %161 = vst [vmem:[%s486_s2 + $0x18] sm:$0xe] %v157_v59  ;;  %v192_v14 = vmul.f32 %v175_v1, %v168_v62  ;;  %v193_v15 = vmul.f32 %v179_v2, %v169_v63  ;;  %v194_v16 = vmul.f32 %v183_v3, %v168_v62 }
  0x14   :  { %162 = vst [vmem:[%s486_s2 + $0x40] sm:$0xe] %v158_v60  ;;  %163 = vst [vmem:[%s486_s2 + $0x48] sm:$0xe] %v159_v61  ;;  %v195_v17 = vmul.f32 %v187_v4, %v169_v63  ;;  %v230_v18 = vmul.f32 %v213_v10, %v204_v0  ;;  %v231_v19 = vmul.f32 %v217_v11, %v205_v5 }
  0x15   :  { %v232_v20 = vmul.f32 %v213_v10, %v206_v8  ;;  %v233_v21 = vmul.f32 %v217_v11, %v207_v9  ;;  %196 = vst [vmem:[%s486_s2 + $0x10] sm:$0x70] %v192_v14  ;;  %197 = vst [vmem:[%s486_s2 + $0x18] sm:$0x70] %v193_v15  ;;  %v234_v6 = vmul.f32 %v221_v12, %v204_v0 }
  0x16   :  { %198 = vst [vmem:[%s486_s2 + $0x40] sm:$0x70] %v194_v16  ;;  %199 = vst [vmem:[%s486_s2 + $0x48] sm:$0x70] %v195_v17  ;;  %v235_v7 = vmul.f32 %v225_v13, %v205_v5  ;;  %v236_v22 = vmul.f32 %v221_v12, %v206_v8  ;;  %v237_v23 = vmul.f32 %v225_v13, %v207_v9 }
  0x17   :  { %238 = vst [vmem:[%s486_s2 + $0x10] sm:$0x80] %v230_v18  ;;  %239 = vst [vmem:[%s486_s2 + $0x18] sm:$0x80] %v231_v19 }
  0x18   :  { %240 = vst [vmem:[%s486_s2 + $0x20] sm:$0x3] %v232_v20  ;;  %241 = vst [vmem:[%s486_s2 + $0x28] sm:$0x3] %v233_v21 }
  0x19   :  { %242 = vst [vmem:[%s486_s2 + $0x40] sm:$0x80] %v234_v6  ;;  %243 = vst [vmem:[%s486_s2 + $0x48] sm:$0x80] %v235_v7 }
  0x1a   :  { %244 = vst [vmem:[%s486_s2 + $0x50] sm:$0x3] %v236_v22  ;;  %245 = vst [vmem:[%s486_s2 + $0x58] sm:$0x3] %v237_v23 }

</bundles_post_ra>
